<compile_context>
chip_gen: v6e
topology: v6e:2x2x1
jax: 0.10.0
libtpu: 0.0.40
codegen_flags: <defaults>
</compile_context>

<pallas_src>
import functools

import numpy as np

import jax
import jax.numpy as jnp
from jax import lax
from jax.experimental import pallas as pl
from jax.experimental.pallas import tpu as pltpu


def _round_up(x, m):
    return ((x + m - 1) // m) * m


# ----------------------------------------------------------------------------
# Pallas kernel: per lane-tile TPS mapping -> flow -> separable bilinear warp
# ----------------------------------------------------------------------------
def _tps_warp_kernel(params_ref, img_ref, out_ref, *, C, H, W, N, TN, OUT_ROWS):
    f32 = jnp.float32
    step = pl.program_id(0)

    # ---- flat output-pixel coordinates of this lane tile (row-major (i, j)) ----
    lane = lax.broadcasted_iota(jnp.int32, (1, TN), 1)
    if TN % W == 0:
        # tile starts at an output-row boundary: no runtime division needed
        row0 = step * (TN // W)
        v = lane
    else:
        start = step * TN
        row0 = start // W           # scalar constant-divisor div/mod
        v = (start % W) + lane
    # v // W with a small-quotient float divide; +0.5 keeps the true quotient away
    # from integers so floor() is exact (quotient <= 1 + TN/W, far above f32 ulp).
    q = jnp.floor((v.astype(f32) + 0.5) * (1.0 / float(W))).astype(jnp.int32)
    j_i = v - q * W
    i_i = row0 + q
    i = i_i.astype(f32)             # y pixel coordinate, (1, TN)
    j = j_i.astype(f32)             # x pixel coordinate, (1, TN)

    # ---- scalar TPS parameters from SMEM ----
    AX = [params_ref[k] for k in range(3)]
    AY = [params_ref[3 + k] for k in range(3)]
    WX = [params_ref[6 + k] for k in range(N)]
    WY = [params_ref[6 + N + k] for k in range(N)]
    PX = [params_ref[6 + 2 * N + k] for k in range(N)]
    PY = [params_ref[6 + 3 * N + k] for k in range(N)]

    # ---- TPS base grid (torch.linspace(-1, 1, W/H) -> align_corners=True) ----
    sx = 2.0 / float(max(W - 1, 1))
    sy = 2.0 / float(max(H - 1, 1))
    x_t = j * sx - 1.0
    y_t = i * sy - 1.0

    # ---- TPS mapping (RandomTPS.get_params), evaluated analytically per pixel ----
    map_xn = AX[0] + AX[1] * x_t + AX[2] * y_t
    map_yn = AY[0] + AY[1] * x_t + AY[2] * y_t
    for k in range(N):
        dx = x_t - PX[k]
        dy = y_t - PY[k]
        d2 = dx * dx + dy * dy
        d2 = jnp.where(d2 == 0.0, 1.0, d2)
        U = d2 * jnp.log(d2)
        map_xn = map_xn + WX[k] * U
        map_yn = map_yn + WY[k] * U

    # ---- unnormalise_and_convert_mapping_to_flow (channel-first) ----
    map_x = (map_xn + 1.0) * (float(W - 1) * 0.5)
    map_y = (map_yn + 1.0) * (float(H - 1) * 0.5)
    flow_x = map_x - j
    flow_y = map_y - i

    # ---- grid_sample(align_corners=True): sample coords are the mapping itself ----
    # (no vx/vy normalization round trip -> no FP-induced floor() flips)
    ix = map_x
    iy = map_y
    x0 = jnp.floor(ix)
    y0 = jnp.floor(iy)
    wx1 = ix - x0
    wx0 = 1.0 - wx1
    wy1 = iy - y0
    wy0 = 1.0 - wy1
    x0i = x0.astype(jnp.int32)
    y0i = y0.astype(jnp.int32)

    # ---- separable one-hot interpolation matrices (tiny: (W,TN) and (H,TN)).
    #      Zeros padding is implicit: out-of-range corner indices never match the
    #      in-range iota, so those corners contribute exactly 0. ----
    xq = lax.broadcasted_iota(jnp.int32, (W, TN), 0)
    Cx = jnp.where(xq == x0i, wx0, 0.0) + jnp.where(xq == x0i + 1, wx1, 0.0)
    yq = lax.broadcasted_iota(jnp.int32, (H, TN), 0)
    Ry = jnp.where(yq == y0i, wy0, 0.0) + jnp.where(yq == y0i + 1, wy1, 0.0)

    # ---- stage 1: column interpolation on the MXU: (C*H, W) @ (W, TN) ----
    t_cols = jnp.dot(img_ref[...], Cx.astype(img_ref.dtype),
                     preferred_element_type=f32)          # (C*H, TN) f32

    # ---- stage 2: row interpolation (VPU multiply + cross-sublane reduce) ----
    rows = []
    for c in range(C):
        seg = t_cols[c * H:(c + 1) * H, :]                # (H, TN), H-aligned slice
        rows.append(jnp.sum(seg * Ry, axis=0, keepdims=True))

    # ---- masks: warp validity (vgrid box) + border mask (create_border_mask) ----
    wmask = ((map_xn >= -1.0) & (map_xn <= 1.0) &
             (map_yn >= -1.0) & (map_yn <= 1.0)).astype(f32)
    bmask = ((map_x >= 0.0) & (map_x <= float(W - 1)) &
             (map_y >= 0.0) & (map_y <= float(H - 1))).astype(f32)

    # packed lane-dense output: rows 0..C-1 image, C..C+1 flow, C+2 warp mask,
    # C+3 border mask, remainder zero padding to a full sublane tile.
    rows += [flow_x, flow_y, wmask, bmask]
    pad = OUT_ROWS - (C + 4)
    if pad > 0:
        rows.append(jnp.zeros((pad, TN), f32))
    out_ref[...] = jnp.concatenate(rows, axis=0)


# ----------------------------------------------------------------------------
# Generation-aware VMEM budgeting and lane-tile selection
# ----------------------------------------------------------------------------
def _vmem_budget_bytes():
    """Per-core VMEM budget with headroom (v7x: 64 MiB phys, v5e/v6e: 128 MiB)."""
    try:
        cap = int(pltpu.get_tpu_info().vmem_capacity_bytes)
    except Exception:
        cap = 64 * 1024 * 1024          # conservative fallback (v7x per-core VMEM)
    return max(min(cap - (12 << 20), int(cap * 0.85)), 16 << 20)


def _pick_lane_tile(H, W, C, out_rows, budget_bytes):
    """Largest lane tile TN dividing H*W that keeps the honest per-step live set
    (resident image x2 pipeline buffers, double-buffered output block, one-hots,
    stage-1 result, stage-2 product) under the per-chip budget; prefers >= 2 steps."""
    HW = H * W
    CH = C * H
    # resident image: the pipeline keeps 2 buffers; bf16, padded to (16, 128) tiles
    fixed = 2 * _round_up(CH, 16) * _round_up(W, 128) * 2 + (2 << 20)
    per_lane = (10 * W          # Cx f32 + bf16 + int32 iota
                + 12 * H        # Ry f32 + int32 iota + stage-2 product
                + 4 * CH        # stage-1 matmul result (f32)
                + 8 * out_rows  # double-buffered output block (f32)
                + 128)          # (1, TN) per-pixel temporaries
    cands = [tn for tn in (4096, 2048, 1024, 512, 256, 128) if HW % tn == 0]
    if not cands:
        tn = HW                 # single full tile (block dim == full array dim)
        return tn, fixed + per_lane * tn
    for tn in cands:
        if fixed + per_lane * tn <= budget_bytes and HW // tn >= 2:
            return tn, fixed + per_lane * tn
    for tn in cands:
        if fixed + per_lane * tn <= budget_bytes:
            return tn, fixed + per_lane * tn
    tn = cands[-1]
    return tn, fixed + per_lane * tn


# ----------------------------------------------------------------------------
# Plain-JAX glue: RandomTPS buffers / random params (get_params scalar part)
# ----------------------------------------------------------------------------
def _compute_L_inverse(P_X, P_Y, reg_factor=0.0):
    N = P_X.shape[0]
    Xmat = np.tile(P_X, (1, N))
    Ymat = np.tile(P_Y, (1, N))
    d2 = (Xmat - Xmat.T) ** 2 + (Ymat - Ymat.T) ** 2
    d2[d2 == 0] = 1.0
    K = d2 * np.log(d2)
    if reg_factor != 0:
        K = K + np.eye(N) * reg_factor
    O = np.ones((N, 1), dtype=np.float64)
    Z = np.zeros((3, 3), dtype=np.float64)
    P = np.concatenate([O, P_X, P_Y], axis=1)
    L = np.concatenate([np.concatenate([K, P], axis=1),
                        np.concatenate([P.T, Z], axis=1)], axis=0)
    return np.linalg.inv(L)


def _make_tps_params(key, grid_size, random_t_tps, reg_factor,
                     parameterize_with_gaussian):
    """Packed scalar params: [A_X(3), A_Y(3), W_X(N), W_Y(N), P_X(N), P_Y(N)]."""
    N = grid_size * grid_size
    axis = np.linspace(-1, 1, grid_size)
    P_Yg, P_Xg = np.meshgrid(axis, axis)        # matches torch: P_Y, P_X = meshgrid
    P_X = P_Xg.reshape(-1, 1)
    P_Y = P_Yg.reshape(-1, 1)
    Li = jnp.asarray(_compute_L_inverse(P_X, P_Y, reg_factor), dtype=jnp.float32)

    base = jnp.concatenate([jnp.asarray(P_X[:, 0], jnp.float32),
                            jnp.asarray(P_Y[:, 0], jnp.float32)])
    if parameterize_with_gaussian:
        theta = base + jax.random.normal(key, (2 * N,), jnp.float32) * random_t_tps
    else:
        theta = base + (jax.random.uniform(key, (2 * N,), jnp.float32) - 0.5) \
            * 2.0 * random_t_tps
    Q_X = theta[:N][:, None]
    Q_Y = theta[N:][:, None]
    W_X = (Li[:N, :N] @ Q_X)[:, 0]
    W_Y = (Li[:N, :N] @ Q_Y)[:, 0]
    A_X = (Li[N:, :N] @ Q_X)[:, 0]
    A_Y = (Li[N:, :N] @ Q_Y)[:, 0]
    return jnp.concatenate([
        A_X, A_Y, W_X, W_Y,
        jnp.asarray(P_X[:, 0], jnp.float32),
        jnp.asarray(P_Y[:, 0], jnp.float32),
    ]).astype(jnp.float32)


def random_tps_forward(image, key,
                       random_t_tps=0.3, grid_size=3, reg_factor=0.0,
                       parameterize_with_gaussian=False,
                       min_fraction_valid_corr=0.1):
    """Equivalent of RandomTPS.forward applied to sample['image_prime'].

    image: (C, H, W) float32.
    Returns (image_prime (C,H,W), flow_gt (2,H,W), mask (H,W) bool)."""
    C, H, W = image.shape
    HW = H * W
    N = grid_size * grid_size
    OUT_ROWS = _round_up(C + 4, 8)

    params = _make_tps_params(key, grid_size, random_t_tps, reg_factor,
                              parameterize_with_gaussian)

    # image as (C*H, W) bf16: stage-1 MXU operand with M = C*H, K = W.
    img2d = image.reshape(C * H, W).astype(jnp.bfloat16)

    budget = _vmem_budget_bytes()
    TN, vmem_need = _pick_lane_tile(H, W, C, OUT_ROWS, budget)
    grid = (HW // TN,)
    vmem_limit = int(min(budget, max(int(vmem_need * 1.25), 32 * 1024 * 1024)))

    kernel = functools.partial(_tps_warp_kernel, C=C, H=H, W=W, N=N,
                               TN=TN, OUT_ROWS=OUT_ROWS)
    out = pl.pallas_call(
        kernel,
        grid=grid,
        out_shape=jax.ShapeDtypeStruct((OUT_ROWS, HW), jnp.float32),
        in_specs=[
            pl.BlockSpec(memory_space=pltpu.MemorySpace.SMEM),   # scalar TPS params
            pl.BlockSpec((C * H, W), lambda t: (0, 0)),          # whole image, resident
        ],
        out_specs=pl.BlockSpec((OUT_ROWS, TN), lambda t: (0, t)),
        compiler_params=pltpu.CompilerParams(
            dimension_semantics=("parallel",),   # independent steps -> 2 TCs on v7x
            vmem_limit_bytes=vmem_limit,
        ),
    )(params, img2d)

    image_prime = out[:C].reshape(C, H, W)
    flow_gt = out[C:C + 2].reshape(2, H, W)
    warp_mask = out[C + 2].reshape(H, W) > 0.5
    border_mask = out[C + 3].reshape(H, W) > 0.5
    # Reference thresholds the *border* mask sum (mask_corr_gt) for the swap.
    use_border = jnp.sum(out[C + 3]) < (H * W * min_fraction_valid_corr)
    mask = jnp.where(use_border, border_mask, warp_mask)
    return image_prime, flow_gt, mask


# ----------------------------------------------------------------------------
# Pure-JAX reference (self-test only, identical math, gather-based bilinear)
# ----------------------------------------------------------------------------
def _reference_forward(image, params, min_fraction_valid_corr):
    C, H, W = image.shape
    N = (params.shape[0] - 6) // 4
    AX, AY = params[0:3], params[3:6]
    WX, WY = params[6:6 + N], params[6 + N:6 + 2 * N]
    PX, PY = params[6 + 2 * N:6 + 3 * N], params[6 + 3 * N:6 + 4 * N]

    ii, jj = jnp.meshgrid(jnp.arange(H, dtype=jnp.float32),
                          jnp.arange(W, dtype=jnp.float32), indexing="ij")
    x_t = jj * (2.0 / float(max(W - 1, 1))) - 1.0
    y_t = ii * (2.0 / float(max(H - 1, 1))) - 1.0
    map_xn = AX[0] + AX[1] * x_t + AX[2] * y_t
    map_yn = AY[0] + AY[1] * x_t + AY[2] * y_t
    for k in range(N):
        d2 = (x_t - PX[k]) ** 2 + (y_t - PY[k]) ** 2
        d2 = jnp.where(d2 == 0.0, 1.0, d2)
        U = d2 * jnp.log(d2)
        map_xn = map_xn + WX[k] * U
        map_yn = map_yn + WY[k] * U
    map_x = (map_xn + 1.0) * (float(W - 1) * 0.5)
    map_y = (map_yn + 1.0) * (float(H - 1) * 0.5)
    flow = jnp.stack([map_x - jj, map_y - ii], axis=0)

    x0 = jnp.floor(map_x)
    y0 = jnp.floor(map_y)
    wx1, wy1 = map_x - x0, map_y - y0
    wx0, wy0 = 1.0 - wx1, 1.0 - wy1
    x0i, y0i = x0.astype(jnp.int32), y0.astype(jnp.int32)

    def samp(xi, yi, wgt):
        valid = (xi >= 0) & (xi <= W - 1) & (yi >= 0) & (yi <= H - 1)
        vals = image[:, jnp.clip(yi, 0, H - 1), jnp.clip(xi, 0, W - 1)]
        return vals * (wgt * valid)[None]

    img_prime = (samp(x0i, y0i, wx0 * wy0) + samp(x0i + 1, y0i, wx1 * wy0)
                 + samp(x0i, y0i + 1, wx0 * wy1) + samp(x0i + 1, y0i + 1, wx1 * wy1))

    wmask = (map_xn >= -1.0) & (map_xn <= 1.0) & (map_yn >= -1.0) & (map_yn <= 1.0)
    bmask = (map_x >= 0.0) & (map_x <= W - 1.0) & (map_y >= 0.0) & (map_y <= H - 1.0)
    use_border = jnp.sum(bmask.astype(jnp.float32)) < (H * W * min_fraction_valid_corr)
    mask = jnp.where(use_border, bmask, wmask)
    return img_prime, flow, mask


if __name__ == "__main__":
    key = jax.random.PRNGKey(0)
    k_img, k_par = jax.random.split(key)
    C, H, W = 3, 16, 16
    image = jax.random.uniform(k_img, (C, H, W), jnp.float32)   # sample['image_prime']

    image_prime, flow_gt, mask = random_tps_forward(image, k_par)
    jax.block_until_ready((image_prime, flow_gt, mask))

    assert image_prime.shape == (C, H, W)
    assert flow_gt.shape == (2, H, W)
    assert mask.shape == (H, W)
    assert bool(jnp.all(jnp.isfinite(image_prime)))
    assert bool(jnp.all(jnp.isfinite(flow_gt)))

    # correctness self-check against a pure-JAX reference (bf16 image/weights in the
    # kernel -> generous absolute tolerance on the warped image)
    params = _make_tps_params(k_par, 3, 0.3, 0.0, False)
    ref_img, ref_flow, ref_mask = _reference_forward(image, params, 0.1)
    err_img = float(jnp.max(jnp.abs(image_prime - ref_img)))
    err_flow = float(jnp.max(jnp.abs(flow_gt - ref_flow)))
    assert err_img < 5e-2, f"image mismatch: {err_img}"
    assert err_flow < 1e-2, f"flow mismatch: {err_flow}"
    assert int(jnp.sum(mask != ref_mask)) <= 3, "mask mismatch"

    print("KERNEL_OK")
</pallas_src>

<mosaic_0001>
module attributes {stable_mosaic.version = 11 : i64} {
  func.func @_tps_warp_kernel(%arg0: i32, %arg1: memref<42xf32, #tpu.memory_space<smem>>, %arg2: memref<48x16xbf16, #tpu.memory_space<vmem>>, %arg3: memref<8x128xf32, #tpu.memory_space<vmem>>) attributes {dimension_semantics = [#tpu.dimension_semantics<parallel>], iteration_bounds = array<i64: 2>, scalar_prefetch = 0 : i64, scratch_operands = 0 : i64, tpu.core_type = #tpu.core_type<tc>, window_params = [{transform_indices = @transform_0, window_bounds = array<i64: 42>}, {pipeline_mode = #tpu.pipeline_mode<synchronous>, transform_indices = @transform_1, window_bounds = array<i64: 48, 16>}, {transform_indices = @transform_2, window_bounds = array<i64: 8, 128>}]} {
    %0 = tpu.iota {dimensions = array<i32: 1>} : vector<1x128xi32>
    %c8_i32 = arith.constant 8 : i32
    %1 = arith.muli %arg0, %c8_i32 : i32
    %2 = arith.sitofp %0 : vector<1x128xi32> to vector<1x128xf32>
    %cst = arith.constant 5.000000e-01 : f32
    %3 = vector.broadcast %cst : f32 to vector<1x128xf32>
    %4 = arith.addf %2, %3 : vector<1x128xf32>
    %cst_0 = arith.constant 6.250000e-02 : f32
    %5 = vector.broadcast %cst_0 : f32 to vector<1x128xf32>
    %6 = arith.mulf %4, %5 : vector<1x128xf32>
    %7 = math.floor %6 : vector<1x128xf32>
    %8 = arith.fptosi %7 : vector<1x128xf32> to vector<1x128xi32>
    %c16_i32 = arith.constant 16 : i32
    %9 = vector.broadcast %c16_i32 : i32 to vector<1x128xi32>
    %10 = arith.muli %8, %9 : vector<1x128xi32>
    %11 = arith.subi %0, %10 : vector<1x128xi32>
    %12 = vector.broadcast %1 : i32 to vector<1x128xi32>
    %13 = arith.addi %12, %8 : vector<1x128xi32>
    %14 = arith.sitofp %13 : vector<1x128xi32> to vector<1x128xf32>
    %15 = arith.sitofp %11 : vector<1x128xi32> to vector<1x128xf32>
    %c0 = arith.constant 0 : index
    %16 = memref.load %arg1[%c0] : memref<42xf32, #tpu.memory_space<smem>>
    %c1 = arith.constant 1 : index
    %17 = memref.load %arg1[%c1] : memref<42xf32, #tpu.memory_space<smem>>
    %c2 = arith.constant 2 : index
    %18 = memref.load %arg1[%c2] : memref<42xf32, #tpu.memory_space<smem>>
    %c3 = arith.constant 3 : index
    %19 = memref.load %arg1[%c3] : memref<42xf32, #tpu.memory_space<smem>>
    %c4 = arith.constant 4 : index
    %20 = memref.load %arg1[%c4] : memref<42xf32, #tpu.memory_space<smem>>
    %c5 = arith.constant 5 : index
    %21 = memref.load %arg1[%c5] : memref<42xf32, #tpu.memory_space<smem>>
    %c6 = arith.constant 6 : index
    %22 = memref.load %arg1[%c6] : memref<42xf32, #tpu.memory_space<smem>>
    %c7 = arith.constant 7 : index
    %23 = memref.load %arg1[%c7] : memref<42xf32, #tpu.memory_space<smem>>
    %c8 = arith.constant 8 : index
    %24 = memref.load %arg1[%c8] : memref<42xf32, #tpu.memory_space<smem>>
    %c9 = arith.constant 9 : index
    %25 = memref.load %arg1[%c9] : memref<42xf32, #tpu.memory_space<smem>>
    %c10 = arith.constant 10 : index
    %26 = memref.load %arg1[%c10] : memref<42xf32, #tpu.memory_space<smem>>
    %c11 = arith.constant 11 : index
    %27 = memref.load %arg1[%c11] : memref<42xf32, #tpu.memory_space<smem>>
    %c12 = arith.constant 12 : index
    %28 = memref.load %arg1[%c12] : memref<42xf32, #tpu.memory_space<smem>>
    %c13 = arith.constant 13 : index
    %29 = memref.load %arg1[%c13] : memref<42xf32, #tpu.memory_space<smem>>
    %c14 = arith.constant 14 : index
    %30 = memref.load %arg1[%c14] : memref<42xf32, #tpu.memory_space<smem>>
    %c15 = arith.constant 15 : index
    %31 = memref.load %arg1[%c15] : memref<42xf32, #tpu.memory_space<smem>>
    %c16 = arith.constant 16 : index
    %32 = memref.load %arg1[%c16] : memref<42xf32, #tpu.memory_space<smem>>
    %c17 = arith.constant 17 : index
    %33 = memref.load %arg1[%c17] : memref<42xf32, #tpu.memory_space<smem>>
    %c18 = arith.constant 18 : index
    %34 = memref.load %arg1[%c18] : memref<42xf32, #tpu.memory_space<smem>>
    %c19 = arith.constant 19 : index
    %35 = memref.load %arg1[%c19] : memref<42xf32, #tpu.memory_space<smem>>
    %c20 = arith.constant 20 : index
    %36 = memref.load %arg1[%c20] : memref<42xf32, #tpu.memory_space<smem>>
    %c21 = arith.constant 21 : index
    %37 = memref.load %arg1[%c21] : memref<42xf32, #tpu.memory_space<smem>>
    %c22 = arith.constant 22 : index
    %38 = memref.load %arg1[%c22] : memref<42xf32, #tpu.memory_space<smem>>
    %c23 = arith.constant 23 : index
    %39 = memref.load %arg1[%c23] : memref<42xf32, #tpu.memory_space<smem>>
    %c24 = arith.constant 24 : index
    %40 = memref.load %arg1[%c24] : memref<42xf32, #tpu.memory_space<smem>>
    %c25 = arith.constant 25 : index
    %41 = memref.load %arg1[%c25] : memref<42xf32, #tpu.memory_space<smem>>
    %c26 = arith.constant 26 : index
    %42 = memref.load %arg1[%c26] : memref<42xf32, #tpu.memory_space<smem>>
    %c27 = arith.constant 27 : index
    %43 = memref.load %arg1[%c27] : memref<42xf32, #tpu.memory_space<smem>>
    %c28 = arith.constant 28 : index
    %44 = memref.load %arg1[%c28] : memref<42xf32, #tpu.memory_space<smem>>
    %c29 = arith.constant 29 : index
    %45 = memref.load %arg1[%c29] : memref<42xf32, #tpu.memory_space<smem>>
    %c30 = arith.constant 30 : index
    %46 = memref.load %arg1[%c30] : memref<42xf32, #tpu.memory_space<smem>>
    %c31 = arith.constant 31 : index
    %47 = memref.load %arg1[%c31] : memref<42xf32, #tpu.memory_space<smem>>
    %c32 = arith.constant 32 : index
    %48 = memref.load %arg1[%c32] : memref<42xf32, #tpu.memory_space<smem>>
    %c33 = arith.constant 33 : index
    %49 = memref.load %arg1[%c33] : memref<42xf32, #tpu.memory_space<smem>>
    %c34 = arith.constant 34 : index
    %50 = memref.load %arg1[%c34] : memref<42xf32, #tpu.memory_space<smem>>
    %c35 = arith.constant 35 : index
    %51 = memref.load %arg1[%c35] : memref<42xf32, #tpu.memory_space<smem>>
    %c36 = arith.constant 36 : index
    %52 = memref.load %arg1[%c36] : memref<42xf32, #tpu.memory_space<smem>>
    %c37 = arith.constant 37 : index
    %53 = memref.load %arg1[%c37] : memref<42xf32, #tpu.memory_space<smem>>
    %c38 = arith.constant 38 : index
    %54 = memref.load %arg1[%c38] : memref<42xf32, #tpu.memory_space<smem>>
    %c39 = arith.constant 39 : index
    %55 = memref.load %arg1[%c39] : memref<42xf32, #tpu.memory_space<smem>>
    %c40 = arith.constant 40 : index
    %56 = memref.load %arg1[%c40] : memref<42xf32, #tpu.memory_space<smem>>
    %c41 = arith.constant 41 : index
    %57 = memref.load %arg1[%c41] : memref<42xf32, #tpu.memory_space<smem>>
    %cst_1 = arith.constant 0.13333334 : f32
    %58 = vector.broadcast %cst_1 : f32 to vector<1x128xf32>
    %59 = arith.mulf %15, %58 : vector<1x128xf32>
    %cst_2 = arith.constant 1.000000e+00 : f32
    %60 = vector.broadcast %cst_2 : f32 to vector<1x128xf32>
    %61 = arith.subf %59, %60 : vector<1x128xf32>
    %cst_3 = arith.constant 0.13333334 : f32
    %62 = vector.broadcast %cst_3 : f32 to vector<1x128xf32>
    %63 = arith.mulf %14, %62 : vector<1x128xf32>
    %cst_4 = arith.constant 1.000000e+00 : f32
    %64 = vector.broadcast %cst_4 : f32 to vector<1x128xf32>
    %65 = arith.subf %63, %64 : vector<1x128xf32>
    %66 = vector.broadcast %17 : f32 to vector<1x128xf32>
    %67 = arith.mulf %66, %61 : vector<1x128xf32>
    %68 = vector.broadcast %16 : f32 to vector<1x128xf32>
    %69 = arith.addf %68, %67 : vector<1x128xf32>
    %70 = vector.broadcast %18 : f32 to vector<1x128xf32>
    %71 = arith.mulf %70, %65 : vector<1x128xf32>
    %72 = arith.addf %69, %71 : vector<1x128xf32>
    %73 = vector.broadcast %20 : f32 to vector<1x128xf32>
    %74 = arith.mulf %73, %61 : vector<1x128xf32>
    %75 = vector.broadcast %19 : f32 to vector<1x128xf32>
    %76 = arith.addf %75, %74 : vector<1x128xf32>
    %77 = vector.broadcast %21 : f32 to vector<1x128xf32>
    %78 = arith.mulf %77, %65 : vector<1x128xf32>
    %79 = arith.addf %76, %78 : vector<1x128xf32>
    %80 = vector.broadcast %40 : f32 to vector<1x128xf32>
    %81 = arith.subf %61, %80 : vector<1x128xf32>
    %82 = vector.broadcast %49 : f32 to vector<1x128xf32>
    %83 = arith.subf %65, %82 : vector<1x128xf32>
    %84 = arith.mulf %81, %81 : vector<1x128xf32>
    %85 = arith.mulf %83, %83 : vector<1x128xf32>
    %86 = arith.addf %84, %85 : vector<1x128xf32>
    %cst_5 = arith.constant 0.000000e+00 : f32
    %87 = vector.broadcast %cst_5 : f32 to vector<1x128xf32>
    %88 = arith.cmpf oeq, %86, %87 : vector<1x128xf32>
    %cst_6 = arith.constant 1.000000e+00 : f32
    %89 = vector.broadcast %cst_6 : f32 to vector<1x128xf32>
    %90 = arith.select %88, %89, %86 : vector<1x128xi1>, vector<1x128xf32>
    %91 = math.log %90 : vector<1x128xf32>
    %92 = arith.mulf %90, %91 : vector<1x128xf32>
    %93 = vector.broadcast %22 : f32 to vector<1x128xf32>
    %94 = arith.mulf %93, %92 : vector<1x128xf32>
    %95 = arith.addf %72, %94 : vector<1x128xf32>
    %96 = vector.broadcast %31 : f32 to vector<1x128xf32>
    %97 = arith.mulf %96, %92 : vector<1x128xf32>
    %98 = arith.addf %79, %97 : vector<1x128xf32>
    %99 = vector.broadcast %41 : f32 to vector<1x128xf32>
    %100 = arith.subf %61, %99 : vector<1x128xf32>
    %101 = vector.broadcast %50 : f32 to vector<1x128xf32>
    %102 = arith.subf %65, %101 : vector<1x128xf32>
    %103 = arith.mulf %100, %100 : vector<1x128xf32>
    %104 = arith.mulf %102, %102 : vector<1x128xf32>
    %105 = arith.addf %103, %104 : vector<1x128xf32>
    %cst_7 = arith.constant 0.000000e+00 : f32
    %106 = vector.broadcast %cst_7 : f32 to vector<1x128xf32>
    %107 = arith.cmpf oeq, %105, %106 : vector<1x128xf32>
    %cst_8 = arith.constant 1.000000e+00 : f32
    %108 = vector.broadcast %cst_8 : f32 to vector<1x128xf32>
    %109 = arith.select %107, %108, %105 : vector<1x128xi1>, vector<1x128xf32>
    %110 = math.log %109 : vector<1x128xf32>
    %111 = arith.mulf %109, %110 : vector<1x128xf32>
    %112 = vector.broadcast %23 : f32 to vector<1x128xf32>
    %113 = arith.mulf %112, %111 : vector<1x128xf32>
    %114 = arith.addf %95, %113 : vector<1x128xf32>
    %115 = vector.broadcast %32 : f32 to vector<1x128xf32>
    %116 = arith.mulf %115, %111 : vector<1x128xf32>
    %117 = arith.addf %98, %116 : vector<1x128xf32>
    %118 = vector.broadcast %42 : f32 to vector<1x128xf32>
    %119 = arith.subf %61, %118 : vector<1x128xf32>
    %120 = vector.broadcast %51 : f32 to vector<1x128xf32>
    %121 = arith.subf %65, %120 : vector<1x128xf32>
    %122 = arith.mulf %119, %119 : vector<1x128xf32>
    %123 = arith.mulf %121, %121 : vector<1x128xf32>
    %124 = arith.addf %122, %123 : vector<1x128xf32>
    %cst_9 = arith.constant 0.000000e+00 : f32
    %125 = vector.broadcast %cst_9 : f32 to vector<1x128xf32>
    %126 = arith.cmpf oeq, %124, %125 : vector<1x128xf32>
    %cst_10 = arith.constant 1.000000e+00 : f32
    %127 = vector.broadcast %cst_10 : f32 to vector<1x128xf32>
    %128 = arith.select %126, %127, %124 : vector<1x128xi1>, vector<1x128xf32>
    %129 = math.log %128 : vector<1x128xf32>
    %130 = arith.mulf %128, %129 : vector<1x128xf32>
    %131 = vector.broadcast %24 : f32 to vector<1x128xf32>
    %132 = arith.mulf %131, %130 : vector<1x128xf32>
    %133 = arith.addf %114, %132 : vector<1x128xf32>
    %134 = vector.broadcast %33 : f32 to vector<1x128xf32>
    %135 = arith.mulf %134, %130 : vector<1x128xf32>
    %136 = arith.addf %117, %135 : vector<1x128xf32>
    %137 = vector.broadcast %43 : f32 to vector<1x128xf32>
    %138 = arith.subf %61, %137 : vector<1x128xf32>
    %139 = vector.broadcast %52 : f32 to vector<1x128xf32>
    %140 = arith.subf %65, %139 : vector<1x128xf32>
    %141 = arith.mulf %138, %138 : vector<1x128xf32>
    %142 = arith.mulf %140, %140 : vector<1x128xf32>
    %143 = arith.addf %141, %142 : vector<1x128xf32>
    %cst_11 = arith.constant 0.000000e+00 : f32
    %144 = vector.broadcast %cst_11 : f32 to vector<1x128xf32>
    %145 = arith.cmpf oeq, %143, %144 : vector<1x128xf32>
    %cst_12 = arith.constant 1.000000e+00 : f32
    %146 = vector.broadcast %cst_12 : f32 to vector<1x128xf32>
    %147 = arith.select %145, %146, %143 : vector<1x128xi1>, vector<1x128xf32>
    %148 = math.log %147 : vector<1x128xf32>
    %149 = arith.mulf %147, %148 : vector<1x128xf32>
    %150 = vector.broadcast %25 : f32 to vector<1x128xf32>
    %151 = arith.mulf %150, %149 : vector<1x128xf32>
    %152 = arith.addf %133, %151 : vector<1x128xf32>
    %153 = vector.broadcast %34 : f32 to vector<1x128xf32>
    %154 = arith.mulf %153, %149 : vector<1x128xf32>
    %155 = arith.addf %136, %154 : vector<1x128xf32>
    %156 = vector.broadcast %44 : f32 to vector<1x128xf32>
    %157 = arith.subf %61, %156 : vector<1x128xf32>
    %158 = vector.broadcast %53 : f32 to vector<1x128xf32>
    %159 = arith.subf %65, %158 : vector<1x128xf32>
    %160 = arith.mulf %157, %157 : vector<1x128xf32>
    %161 = arith.mulf %159, %159 : vector<1x128xf32>
    %162 = arith.addf %160, %161 : vector<1x128xf32>
    %cst_13 = arith.constant 0.000000e+00 : f32
    %163 = vector.broadcast %cst_13 : f32 to vector<1x128xf32>
    %164 = arith.cmpf oeq, %162, %163 : vector<1x128xf32>
    %cst_14 = arith.constant 1.000000e+00 : f32
    %165 = vector.broadcast %cst_14 : f32 to vector<1x128xf32>
    %166 = arith.select %164, %165, %162 : vector<1x128xi1>, vector<1x128xf32>
    %167 = math.log %166 : vector<1x128xf32>
    %168 = arith.mulf %166, %167 : vector<1x128xf32>
    %169 = vector.broadcast %26 : f32 to vector<1x128xf32>
    %170 = arith.mulf %169, %168 : vector<1x128xf32>
    %171 = arith.addf %152, %170 : vector<1x128xf32>
    %172 = vector.broadcast %35 : f32 to vector<1x128xf32>
    %173 = arith.mulf %172, %168 : vector<1x128xf32>
    %174 = arith.addf %155, %173 : vector<1x128xf32>
    %175 = vector.broadcast %45 : f32 to vector<1x128xf32>
    %176 = arith.subf %61, %175 : vector<1x128xf32>
    %177 = vector.broadcast %54 : f32 to vector<1x128xf32>
    %178 = arith.subf %65, %177 : vector<1x128xf32>
    %179 = arith.mulf %176, %176 : vector<1x128xf32>
    %180 = arith.mulf %178, %178 : vector<1x128xf32>
    %181 = arith.addf %179, %180 : vector<1x128xf32>
    %cst_15 = arith.constant 0.000000e+00 : f32
    %182 = vector.broadcast %cst_15 : f32 to vector<1x128xf32>
    %183 = arith.cmpf oeq, %181, %182 : vector<1x128xf32>
    %cst_16 = arith.constant 1.000000e+00 : f32
    %184 = vector.broadcast %cst_16 : f32 to vector<1x128xf32>
    %185 = arith.select %183, %184, %181 : vector<1x128xi1>, vector<1x128xf32>
    %186 = math.log %185 : vector<1x128xf32>
    %187 = arith.mulf %185, %186 : vector<1x128xf32>
    %188 = vector.broadcast %27 : f32 to vector<1x128xf32>
    %189 = arith.mulf %188, %187 : vector<1x128xf32>
    %190 = arith.addf %171, %189 : vector<1x128xf32>
    %191 = vector.broadcast %36 : f32 to vector<1x128xf32>
    %192 = arith.mulf %191, %187 : vector<1x128xf32>
    %193 = arith.addf %174, %192 : vector<1x128xf32>
    %194 = vector.broadcast %46 : f32 to vector<1x128xf32>
    %195 = arith.subf %61, %194 : vector<1x128xf32>
    %196 = vector.broadcast %55 : f32 to vector<1x128xf32>
    %197 = arith.subf %65, %196 : vector<1x128xf32>
    %198 = arith.mulf %195, %195 : vector<1x128xf32>
    %199 = arith.mulf %197, %197 : vector<1x128xf32>
    %200 = arith.addf %198, %199 : vector<1x128xf32>
    %cst_17 = arith.constant 0.000000e+00 : f32
    %201 = vector.broadcast %cst_17 : f32 to vector<1x128xf32>
    %202 = arith.cmpf oeq, %200, %201 : vector<1x128xf32>
    %cst_18 = arith.constant 1.000000e+00 : f32
    %203 = vector.broadcast %cst_18 : f32 to vector<1x128xf32>
    %204 = arith.select %202, %203, %200 : vector<1x128xi1>, vector<1x128xf32>
    %205 = math.log %204 : vector<1x128xf32>
    %206 = arith.mulf %204, %205 : vector<1x128xf32>
    %207 = vector.broadcast %28 : f32 to vector<1x128xf32>
    %208 = arith.mulf %207, %206 : vector<1x128xf32>
    %209 = arith.addf %190, %208 : vector<1x128xf32>
    %210 = vector.broadcast %37 : f32 to vector<1x128xf32>
    %211 = arith.mulf %210, %206 : vector<1x128xf32>
    %212 = arith.addf %193, %211 : vector<1x128xf32>
    %213 = vector.broadcast %47 : f32 to vector<1x128xf32>
    %214 = arith.subf %61, %213 : vector<1x128xf32>
    %215 = vector.broadcast %56 : f32 to vector<1x128xf32>
    %216 = arith.subf %65, %215 : vector<1x128xf32>
    %217 = arith.mulf %214, %214 : vector<1x128xf32>
    %218 = arith.mulf %216, %216 : vector<1x128xf32>
    %219 = arith.addf %217, %218 : vector<1x128xf32>
    %cst_19 = arith.constant 0.000000e+00 : f32
    %220 = vector.broadcast %cst_19 : f32 to vector<1x128xf32>
    %221 = arith.cmpf oeq, %219, %220 : vector<1x128xf32>
    %cst_20 = arith.constant 1.000000e+00 : f32
    %222 = vector.broadcast %cst_20 : f32 to vector<1x128xf32>
    %223 = arith.select %221, %222, %219 : vector<1x128xi1>, vector<1x128xf32>
    %224 = math.log %223 : vector<1x128xf32>
    %225 = arith.mulf %223, %224 : vector<1x128xf32>
    %226 = vector.broadcast %29 : f32 to vector<1x128xf32>
    %227 = arith.mulf %226, %225 : vector<1x128xf32>
    %228 = arith.addf %209, %227 : vector<1x128xf32>
    %229 = vector.broadcast %38 : f32 to vector<1x128xf32>
    %230 = arith.mulf %229, %225 : vector<1x128xf32>
    %231 = arith.addf %212, %230 : vector<1x128xf32>
    %232 = vector.broadcast %48 : f32 to vector<1x128xf32>
    %233 = arith.subf %61, %232 : vector<1x128xf32>
    %234 = vector.broadcast %57 : f32 to vector<1x128xf32>
    %235 = arith.subf %65, %234 : vector<1x128xf32>
    %236 = arith.mulf %233, %233 : vector<1x128xf32>
    %237 = arith.mulf %235, %235 : vector<1x128xf32>
    %238 = arith.addf %236, %237 : vector<1x128xf32>
    %cst_21 = arith.constant 0.000000e+00 : f32
    %239 = vector.broadcast %cst_21 : f32 to vector<1x128xf32>
    %240 = arith.cmpf oeq, %238, %239 : vector<1x128xf32>
    %cst_22 = arith.constant 1.000000e+00 : f32
    %241 = vector.broadcast %cst_22 : f32 to vector<1x128xf32>
    %242 = arith.select %240, %241, %238 : vector<1x128xi1>, vector<1x128xf32>
    %243 = math.log %242 : vector<1x128xf32>
    %244 = arith.mulf %242, %243 : vector<1x128xf32>
    %245 = vector.broadcast %30 : f32 to vector<1x128xf32>
    %246 = arith.mulf %245, %244 : vector<1x128xf32>
    %247 = arith.addf %228, %246 : vector<1x128xf32>
    %248 = vector.broadcast %39 : f32 to vector<1x128xf32>
    %249 = arith.mulf %248, %244 : vector<1x128xf32>
    %250 = arith.addf %231, %249 : vector<1x128xf32>
    %cst_23 = arith.constant 1.000000e+00 : f32
    %251 = vector.broadcast %cst_23 : f32 to vector<1x128xf32>
    %252 = arith.addf %247, %251 : vector<1x128xf32>
    %cst_24 = arith.constant 7.500000e+00 : f32
    %253 = vector.broadcast %cst_24 : f32 to vector<1x128xf32>
    %254 = arith.mulf %252, %253 : vector<1x128xf32>
    %cst_25 = arith.constant 1.000000e+00 : f32
    %255 = vector.broadcast %cst_25 : f32 to vector<1x128xf32>
    %256 = arith.addf %250, %255 : vector<1x128xf32>
    %cst_26 = arith.constant 7.500000e+00 : f32
    %257 = vector.broadcast %cst_26 : f32 to vector<1x128xf32>
    %258 = arith.mulf %256, %257 : vector<1x128xf32>
    %259 = arith.subf %254, %15 : vector<1x128xf32>
    %260 = arith.subf %258, %14 : vector<1x128xf32>
    %261 = math.floor %254 : vector<1x128xf32>
    %262 = math.floor %258 : vector<1x128xf32>
    %263 = arith.subf %254, %261 : vector<1x128xf32>
    %cst_27 = arith.constant 1.000000e+00 : f32
    %264 = vector.broadcast %cst_27 : f32 to vector<1x128xf32>
    %265 = arith.subf %264, %263 : vector<1x128xf32>
    %266 = arith.subf %258, %262 : vector<1x128xf32>
    %cst_28 = arith.constant 1.000000e+00 : f32
    %267 = vector.broadcast %cst_28 : f32 to vector<1x128xf32>
    %268 = arith.subf %267, %266 : vector<1x128xf32>
    %269 = arith.fptosi %261 : vector<1x128xf32> to vector<1x128xi32>
    %270 = arith.fptosi %262 : vector<1x128xf32> to vector<1x128xi32>
    %271 = tpu.iota {dimensions = array<i32: 0>} : vector<16x128xi32>
    %272 = vector.broadcast %269 : vector<1x128xi32> to vector<16x128xi32>
    %273 = arith.cmpi eq, %271, %272 : vector<16x128xi32>
    %cst_29 = arith.constant 0.000000e+00 : f32
    %274 = vector.shape_cast %265 : vector<1x128xf32> to vector<1x128xf32>
    %275 = vector.broadcast %274 : vector<1x128xf32> to vector<16x128xf32>
    %276 = vector.broadcast %cst_29 : f32 to vector<16x128xf32>
    %277 = arith.select %273, %275, %276 : vector<16x128xi1>, vector<16x128xf32>
    %c1_i32 = arith.constant 1 : i32
    %278 = vector.broadcast %c1_i32 : i32 to vector<1x128xi32>
    %279 = arith.addi %269, %278 : vector<1x128xi32>
    %280 = vector.broadcast %279 : vector<1x128xi32> to vector<16x128xi32>
    %281 = arith.cmpi eq, %271, %280 : vector<16x128xi32>
    %cst_30 = arith.constant 0.000000e+00 : f32
    %282 = vector.shape_cast %263 : vector<1x128xf32> to vector<1x128xf32>
    %283 = vector.broadcast %282 : vector<1x128xf32> to vector<16x128xf32>
    %284 = vector.broadcast %cst_30 : f32 to vector<16x128xf32>
    %285 = arith.select %281, %283, %284 : vector<16x128xi1>, vector<16x128xf32>
    %286 = arith.addf %277, %285 : vector<16x128xf32>
    %287 = tpu.iota {dimensions = array<i32: 0>} : vector<16x128xi32>
    %288 = vector.broadcast %270 : vector<1x128xi32> to vector<16x128xi32>
    %289 = arith.cmpi eq, %287, %288 : vector<16x128xi32>
    %cst_31 = arith.constant 0.000000e+00 : f32
    %290 = vector.shape_cast %268 : vector<1x128xf32> to vector<1x128xf32>
    %291 = vector.broadcast %290 : vector<1x128xf32> to vector<16x128xf32>
    %292 = vector.broadcast %cst_31 : f32 to vector<16x128xf32>
    %293 = arith.select %289, %291, %292 : vector<16x128xi1>, vector<16x128xf32>
    %c1_i32_32 = arith.constant 1 : i32
    %294 = vector.broadcast %c1_i32_32 : i32 to vector<1x128xi32>
    %295 = arith.addi %270, %294 : vector<1x128xi32>
    %296 = vector.broadcast %295 : vector<1x128xi32> to vector<16x128xi32>
    %297 = arith.cmpi eq, %287, %296 : vector<16x128xi32>
    %cst_33 = arith.constant 0.000000e+00 : f32
    %298 = vector.shape_cast %266 : vector<1x128xf32> to vector<1x128xf32>
    %299 = vector.broadcast %298 : vector<1x128xf32> to vector<16x128xf32>
    %300 = vector.broadcast %cst_33 : f32 to vector<16x128xf32>
    %301 = arith.select %297, %299, %300 : vector<16x128xi1>, vector<16x128xf32>
    %302 = arith.addf %293, %301 : vector<16x128xf32>
    %c0_34 = arith.constant 0 : index
    %c0_35 = arith.constant 0 : index
    %303 = vector.load %arg2[%c0_34, %c0_35] : memref<48x16xbf16, #tpu.memory_space<vmem>>, vector<48x16xbf16>
    %304 = arith.truncf %286 : vector<16x128xf32> to vector<16x128xbf16>
    %cst_36 = arith.constant dense<0.000000e+00> : vector<48x128xf32>
    %305 = tpu.matmul %303, %304, %cst_36 {dimension_numbers = #tpu.dot_dimension_numbers<[1], [0], [0], [1], [0, 0, 1, 1], [], []>} : vector<48x16xbf16>, vector<16x128xbf16>, vector<48x128xf32> -> vector<48x128xf32>
    %306 = vector.extract_strided_slice %305 {offsets = [0, 0], sizes = [16, 128], strides = [1, 1]} : vector<48x128xf32> to vector<16x128xf32>
    %307 = arith.mulf %306, %302 : vector<16x128xf32>
    %cst_37 = arith.constant dense<0.000000e+00> : vector<128xf32>
    %308 = vector.multi_reduction <add>, %307, %cst_37 [0] : vector<16x128xf32> to vector<128xf32>
    %309 = vector.shape_cast %308 : vector<128xf32> to vector<1x128xf32>
    %310 = vector.extract_strided_slice %305 {offsets = [16, 0], sizes = [16, 128], strides = [1, 1]} : vector<48x128xf32> to vector<16x128xf32>
    %311 = arith.mulf %310, %302 : vector<16x128xf32>
    %cst_38 = arith.constant dense<0.000000e+00> : vector<128xf32>
    %312 = vector.multi_reduction <add>, %311, %cst_38 [0] : vector<16x128xf32> to vector<128xf32>
    %313 = vector.shape_cast %312 : vector<128xf32> to vector<1x128xf32>
    %314 = vector.extract_strided_slice %305 {offsets = [32, 0], sizes = [16, 128], strides = [1, 1]} : vector<48x128xf32> to vector<16x128xf32>
    %315 = arith.mulf %314, %302 : vector<16x128xf32>
    %cst_39 = arith.constant dense<0.000000e+00> : vector<128xf32>
    %316 = vector.multi_reduction <add>, %315, %cst_39 [0] : vector<16x128xf32> to vector<128xf32>
    %317 = vector.shape_cast %316 : vector<128xf32> to vector<1x128xf32>
    %cst_40 = arith.constant -1.000000e+00 : f32
    %318 = vector.broadcast %cst_40 : f32 to vector<1x128xf32>
    %319 = arith.cmpf oge, %247, %318 : vector<1x128xf32>
    %cst_41 = arith.constant 1.000000e+00 : f32
    %320 = vector.broadcast %cst_41 : f32 to vector<1x128xf32>
    %321 = arith.cmpf ole, %247, %320 : vector<1x128xf32>
    %322 = arith.andi %319, %321 : vector<1x128xi1>
    %cst_42 = arith.constant -1.000000e+00 : f32
    %323 = vector.broadcast %cst_42 : f32 to vector<1x128xf32>
    %324 = arith.cmpf oge, %250, %323 : vector<1x128xf32>
    %325 = arith.andi %322, %324 : vector<1x128xi1>
    %cst_43 = arith.constant 1.000000e+00 : f32
    %326 = vector.broadcast %cst_43 : f32 to vector<1x128xf32>
    %327 = arith.cmpf ole, %250, %326 : vector<1x128xf32>
    %328 = arith.andi %325, %327 : vector<1x128xi1>
    %329 = arith.extui %328 : vector<1x128xi1> to vector<1x128xi32>
    %330 = arith.sitofp %329 : vector<1x128xi32> to vector<1x128xf32>
    %cst_44 = arith.constant 0.000000e+00 : f32
    %331 = vector.broadcast %cst_44 : f32 to vector<1x128xf32>
    %332 = arith.cmpf oge, %254, %331 : vector<1x128xf32>
    %cst_45 = arith.constant 1.500000e+01 : f32
    %333 = vector.broadcast %cst_45 : f32 to vector<1x128xf32>
    %334 = arith.cmpf ole, %254, %333 : vector<1x128xf32>
    %335 = arith.andi %332, %334 : vector<1x128xi1>
    %cst_46 = arith.constant 0.000000e+00 : f32
    %336 = vector.broadcast %cst_46 : f32 to vector<1x128xf32>
    %337 = arith.cmpf oge, %258, %336 : vector<1x128xf32>
    %338 = arith.andi %335, %337 : vector<1x128xi1>
    %cst_47 = arith.constant 1.500000e+01 : f32
    %339 = vector.broadcast %cst_47 : f32 to vector<1x128xf32>
    %340 = arith.cmpf ole, %258, %339 : vector<1x128xf32>
    %341 = arith.andi %338, %340 : vector<1x128xi1>
    %342 = arith.extui %341 : vector<1x128xi1> to vector<1x128xi32>
    %343 = arith.sitofp %342 : vector<1x128xi32> to vector<1x128xf32>
    %cst_48 = arith.constant 0.000000e+00 : f32
    %344 = vector.broadcast %cst_48 : f32 to vector<1x128xf32>
    %345 = tpu.concatenate %309, %313, %317, %259, %260, %330, %343, %344 in 0 : vector<1x128xf32>, vector<1x128xf32>, vector<1x128xf32>, vector<1x128xf32>, vector<1x128xf32>, vector<1x128xf32>, vector<1x128xf32>, vector<1x128xf32> -> vector<8x128xf32>
    %c0_49 = arith.constant 0 : index
    %c0_50 = arith.constant 0 : index
    %346 = vector.load %arg3[%c0_49, %c0_50] : memref<8x128xf32, #tpu.memory_space<vmem>>, vector<8x128xf32>
    tpu.vector_store %arg3[%c0_49, %c0_50], %345 {strides = array<i32>} : memref<8x128xf32, #tpu.memory_space<vmem>>, vector<8x128xf32>,
    return
  }
  func.func @transform_0(%arg0: i32) -> i32 {
    %c0_i32 = arith.constant 0 : i32
    %c0_i32_0 = arith.constant 0 : i32
    return %c0_i32 : i32
  }
  func.func @transform_1(%arg0: i32) -> (i32, i32) {
    %c0_i32 = arith.constant 0 : i32
    %c0_i32_0 = arith.constant 0 : i32
    %c0_i32_1 = arith.constant 0 : i32
    return %c0_i32, %c0_i32_0 : i32, i32
  }
  func.func @transform_2(%arg0: i32) -> (i32, i32) {
    %c0_i32 = arith.constant 0 : i32
    %c0_i32_0 = arith.constant 0 : i32
    return %c0_i32, %arg0 : i32, i32
  }
}

</mosaic_0001>

<bundles_post_ra>
// kernel: tpu_custom_call.1
= control target key start
LH: loop header
LB: loop body
LE: loop exit
PB: predicated region body
PF: predicated region fallthrough
CT: control target
= control target key end

     0   :  { %7 = vsyncpa [#allocation4], 0  ;;  %s1254_s0 = inlined_call_operand.vmem [shape: f32[42], index: 0, kind: input, shape index: {}]   ;;  %s1255_s1 = inlined_call_operand.vmem [shape: bf16[48,16], index: 1, kind: input, shape index: {}]   ;;  %s1256_s2 = inlined_call_operand.hbm [shape: f32[8,256], index: 2, kind: output, shape index: {}]  }
   0x1   :  { %8 = vsyncpa [#allocation3], 0 }
   0x2   :  { %10 = vsyncpa [#allocation3 + $0x1], 0  ;;  %s895_s9 = smov 0   ;;  %s897_s10 = smov 0  }
   0x3   :  { %s899_s11 = smov 0   ;;  %s901_s12 = smov 0  }
   0x4 LB: > { %s916_s13 = sadd.s32 4294967295, %s874_s12   ;;  %s634_s14 = sadd.s32 4294967294, %s874_s12   ;;  %s874_s12 = sphi %s901_s12, %s1263_s12   ;;  %s870_s11 = sphi %s899_s11, %s1262_s11   ;;  %s866_s10 = sphi %s897_s10, %s1261_s10   ;;  %s862_s9 = sphi %s895_s9, %s1260_s9  }
   0x5   : > { %s920_s15 = sadd.s32 1, %s874_s12   ;;  %s65_s16 = sadd.s32 1, %s870_s11 }
   0x6   : > { %s62_s17 = ssub.s32 %s874_s12, %s920_s15  ;;  %p75_p0 = scmp.ne.s32.totalorder %s870_s11, %s866_s10 }
   0x7   : > { %p63_p1 = scmp.eq.s32.totalorder %s62_s17, 0  ;;  %p76_p2 = scmp.eq.s32.totalorder %s916_s13, 1 }
   0x8   : > { %p81_p3 = scmp.ne.s32.totalorder %s866_s10, %s862_s9  ;;  %p82_p4 = scmp.eq.s32.totalorder %s634_s14, 1 }
   0x9   : > { %s931_s18 = scalar_select %p63_p1, %s870_s11, %s65_s16  }
   0xa   : > { %p933_p5 = por %p76_p2, %p75_p0  ;;  %p937_p6 = por %p82_p4, %p81_p3 }
   0xb   : > { %p635_p7 = scmp.ge.s32.totalorder %s874_s12, 1  ;;  %p89_p8 = scmp.lt.s32.totalorder %s874_s12, 3 }
   0xc   : > { %p736_p9 = scmp.eq.s32.totalorder %s916_s13, 0  ;;  %s102_s24 = sshll.u32 %s1254_s0, 4  ;;  %s103_s24 = int_to_ptr.vmem [resolvable:$true] %s102_s24 }
   0xd   : > { %p944_p10 = pnand %p635_p7, %p89_p8  ;;  %s795_s25 = scalar_lea.vmem %s103_s24, 16 }
   0xe   : > { %p796_p13 = scmp.ne.s32.totalorder %s103_s24, %s795_s25  ;;  %p803_p3 = scmp.lt.s32.totalorder %s103_s24, %s103_s24 }
   0xf   : > { %p728_p11 = pneg %p944_p10  ;;  %p804_p4 = scmp.lt.s32.totalorder %s795_s25, %s795_s25 }
  0x11   : > { %p729_p12 = pnand %p736_p9, %p728_p11  ;;  %p805_p7 = por %p804_p4, %p803_p3 }
  0x13   : > { %p797_p0 = pneg %p729_p12 }
  0x15   : > { %p798_p1 = pnand %p797_p0, %p796_p13 }
  0x17   : > { %p799_p2 = pneg %p798_p1 }
  0x19   : > { %p806_p8 = pnand %p805_p7, %p799_p2 }
  0x1b   : > { %809 = shalt.err (!%p806_p8)
}
  0x1c   : > { %s876_s26 = smov [#allocation2]   ;;  %118 = sbr.rel (%p944_p10) target bundleno = 369 (0x171), region = 28 }
  0x1d   : > { %731 = dma.vmem_to_smem (!%p729_p12), %s103_s24, 16, %s876_s26, [#allocation4]  }
  0x21   : > { %853 = dma.done.wait (%p736_p9), [#allocation4], 16  }
  0x22   : > { %855 = vsyncadd (%p736_p9), [#allocation4], 4294967280 }
  0x23   : > { %124 = sfence }
  0x24   : > { %v137_v0 = vlaneseq  ;;  %v877_v1 = vmov 0.0   ;;  %vm878_vm0 = vmmov 0   ;;  %s968_s27 = sld [smem:[#allocation2]]  ;;  %s640_s28 = sshll.u32 %s916_s13, 3  ;;  %vm434_vm14 = vcmask 130048  }
  0x25   : > { %700 = vmatprep.subr.bf16.mxu0 %v877_v1  ;;  %714 = vmatprep.subr.bf16.mxu1 %v877_v1  ;;  %s971_s29 = sld [smem:[#allocation2 + $0x1]]  ;;  %v147_v8 = vstv %s640_s28 }
  0x26   : > { %v138_v2 = vand.u32 127, %v137_v0  ;;  %702 = vmatprep.mubr.msk.bf16.mxu0 %vm878_vm0, %v877_v1  ;;  %706 = vmatprep.mubr.msk.bf16.mxu1 %vm878_vm0, %v877_v1  ;;  %s973_s30 = sld [smem:[#allocation2 + $0x2]] }
  0x27   : > { %s975_s3 = sld [smem:[#allocation2 + $0x18]] }
  0x28   : > { %v140_v3 = vcvt.s32.f32 %v138_v2  ;;  %s977_s4 = sld [smem:[#allocation2 + $0x19]] }
  0x29   : > { %s979_s5 = sld [smem:[#allocation2 + $0x1a]] }
  0x2a   : > { %v141_v4 = vadd.f32 0.5, %v140_v3  ;;  %s981_s6 = sld [smem:[#allocation2 + $0x1b]]  ;;  %v199_v24 = vstv %s968_s27 }
  0x2b   : > { %s985_s7 = sld [smem:[#allocation2 + $0x1c]]  ;;  %v197_v22 = vstv %s971_s29 }
  0x2c   : > { %v142_v5 = vmul.f32 0.0625, %v141_v4  ;;  %s987_s8 = sld [smem:[#allocation2 + $0x1d]]  ;;  %v201_v25 = vstv %s973_s30 }
  0x2d   : > { %s990_s14 = sld [smem:[#allocation2 + $0x1e]]  ;;  %v211_v17 = vstv %s975_s3 }
  0x2e   : > { %v143_v6 = vfloor.f32 %v142_v5  ;;  %s992_s16 = sld [smem:[#allocation2 + $0x1f]]  ;;  %v229_v18 = vstv %s977_s4 }
  0x2f   : > { %s673_s17 = sld [smem:[#allocation2 + $0x21]]  ;;  %v247_v19 = vstv %s979_s5 }
  0x30   : > { %v716_v7 = vtrunc.f32 %v143_v6  ;;  %s674_s21 = sld [smem:[#allocation2 + $0x22]]  ;;  %v265_v23 = vstv %s981_s6 }
  0x31   : > { %s999_s22 = sld [smem:[#allocation2 + $0x23]]  ;;  %v283_v26 = vstv %s985_s7 }
  0x32   : > { %v717_v9 = vcvt.f32.s32 %v716_v7  ;;  %s1004_s23 = sld [smem:[#allocation2 + $0x24]]  ;;  %v301_v27 = vstv %s987_s8 }
  0x33   : > { %s1012_s24 = sld [smem:[#allocation2 + $0x25]]  ;;  %v319_v31 = vstv %s990_s14 }
  0x34   : > { %v145_v10 = vmul.u32 16, %v717_v9  ;;  %v983_v11 = vadd.s32 %v717_v9, %v147_v8  ;;  %s1018_s25 = sld [smem:[#allocation2 + $0x26]]  ;;  %v337_v35 = vstv %s992_s16 }
  0x35   : > { %v213_v33 = vstv %s673_s17  ;;  %s1034_s26 = sld [smem:[#allocation2 + $0x27]] }
  0x36   : > { %v146_v12 = vsub.s32 %v138_v2, %v145_v10  ;;  %v149_v13 = vcvt.s32.f32 %v983_v11  ;;  %v231_v38 = vstv %s674_s21  ;;  %s1038_s28 = sld [smem:[#allocation2 + $0x20]] }
  0x37   : > { %v249_v42 = vstv %s999_s22  ;;  %s1042_s29 = sld [smem:[#allocation2 + $0x28]] }
  0x38   : > { %v994_v14 = vcvt.s32.f32 %v146_v12  ;;  %v195_v15 = vmul.f32 0.13333334, %v149_v13  ;;  %v267_v47 = vstv %s1004_s23  ;;  %s1045_s3 = sld [smem:[#allocation2 + $0x29]] }
  0x39   : > { %v285_v51 = vstv %s1012_s24  ;;  %s1049_s4 = sld [smem:[#allocation2 + $0x3]] }
  0x3a   : > { %v193_v16 = vmul.f32 0.13333334, %v994_v14  ;;  %v1008_v21 = vadd.f32 -1.0, %v195_v15  ;;  %v303_v58 = vstv %s1018_s25  ;;  %s1054_s5 = sld [smem:[#allocation2 + $0x4]] }
  0x3b   : > { %s1059_s6 = sld [smem:[#allocation2 + $0x5]]  ;;  %v321_v9 = vstv %s1034_s26 }
  0x3c   : > { %v1006_v20 = vadd.f32 -1.0, %v193_v16  ;;  %v214_v36 = vsub.f32 %v1008_v21, %v213_v33  ;;  %v232_v40 = vsub.f32 %v1008_v21, %v231_v38  ;;  %v250_v45 = vsub.f32 %v1008_v21, %v249_v42  ;;  %s1068_s7 = sld [smem:[#allocation2 + $0x6]] }
  0x3d   : > { %v268_v49 = vsub.f32 %v1008_v21, %v267_v47  ;;  %v286_v54 = vsub.f32 %v1008_v21, %v285_v51  ;;  %v304_v62 = vsub.f32 %v1008_v21, %v303_v58  ;;  %v322_v15 = vsub.f32 %v1008_v21, %v321_v9  ;;  %s1074_s8 = sld [smem:[#allocation2 + $0x7]] }
  0x3e   : > { %v212_v28 = vsub.f32 %v1006_v20, %v211_v17  ;;  %v230_v29 = vsub.f32 %v1006_v20, %v229_v18  ;;  %v248_v30 = vsub.f32 %v1006_v20, %v247_v19  ;;  %v1025_v32 = vmul.f32 %v1006_v20, %v197_v22  ;;  %s1079_s14 = sld [smem:[#allocation2 + $0x8]] }
  0x3f   : > { %v266_v34 = vsub.f32 %v1006_v20, %v265_v23  ;;  %v284_v39 = vsub.f32 %v1006_v20, %v283_v26  ;;  %v302_v43 = vsub.f32 %v1006_v20, %v301_v27  ;;  %v216_v44 = vmul.f32 %v214_v36, %v214_v36  ;;  %s1083_s16 = sld [smem:[#allocation2 + $0x9]] }
  0x40   : > { %v215_v37 = vmul.f32 %v212_v28, %v212_v28  ;;  %v233_v41 = vmul.f32 %v230_v29, %v230_v29  ;;  %v251_v46 = vmul.f32 %v248_v30, %v248_v30  ;;  %v234_v48 = vmul.f32 %v232_v40, %v232_v40  ;;  %s1091_s17 = sld [smem:[#allocation2 + $0xf]] }
  0x41   : > { %v269_v50 = vmul.f32 %v266_v34, %v266_v34  ;;  %v252_v53 = vmul.f32 %v250_v45, %v250_v45  ;;  %v287_v55 = vmul.f32 %v284_v39, %v284_v39  ;;  %v270_v57 = vmul.f32 %v268_v49, %v268_v49  ;;  %s1093_s21 = sld [smem:[#allocation2 + $0x10]] }
  0x42   : > { %v217_v52 = vadd.f32 %v216_v44, %v215_v37  ;;  %v235_v56 = vadd.f32 %v234_v48, %v233_v41  ;;  %v305_v59 = vmul.f32 %v302_v43, %v302_v43  ;;  %v288_v61 = vmul.f32 %v286_v54, %v286_v54  ;;  %s1098_s22 = sld [smem:[#allocation2 + $0x11]] }
  0x43   : > { %v253_v60 = vadd.f32 %v252_v53, %v251_v46  ;;  %v271_v2 = vadd.f32 %v270_v57, %v269_v50  ;;  %v320_v3 = vsub.f32 %v1006_v20, %v319_v31  ;;  %v306_v7 = vmul.f32 %v304_v62, %v304_v62  ;;  %s1105_s23 = sld [smem:[#allocation2 + $0x12]] }
  0x44   : > { %vm218_vm1 = vcmp.eq.f32.partialorder %v217_v52, 0.0  ;;  %vm236_vm2 = vcmp.eq.f32.partialorder %v235_v56, 0.0  ;;  %v289_v5 = vadd.f32 %v288_v61, %v287_v55  ;;  %v338_v17 = vsub.f32 %v1006_v20, %v337_v35  ;;  %s1107_s24 = sld [smem:[#allocation2 + $0xa]] }
  0x45   : > { %v1051_v63 = vsel %vm218_vm1, 1.0, %v217_v52  ;;  %v1057_v4 = vsel %vm236_vm2, 1.0, %v235_v56  ;;  %vm254_vm3 = vcmp.eq.f32.partialorder %v253_v60, 0.0  ;;  %vm272_vm4 = vcmp.eq.f32.partialorder %v271_v2, 0.0  ;;  %s1118_s25 = sld [smem:[#allocation2 + $0x13]] }
  0x46   : > { %777 = vlog2.f32 %v1051_v63  ;;  %v1062_v6 = vsel %vm254_vm3, 1.0, %v253_v60  ;;  %v1065_v8 = vsel %vm272_vm4, 1.0, %v271_v2  ;;  %vm290_vm5 = vcmp.eq.f32.partialorder %v289_v5, 0.0  ;;  %s1120_s26 = sld [smem:[#allocation2 + $0xb]] }
  0x47   : > { %779 = vlog2.f32 %v1057_v4  ;;  %v1071_v10 = vsel %vm290_vm5, 1.0, %v289_v5  ;;  %v307_v12 = vadd.f32 %v306_v7, %v305_v59  ;;  %v323_v16 = vmul.f32 %v320_v3, %v320_v3  ;;  %s1128_s27 = sld [smem:[#allocation2 + $0x14]] }
  0x48   : > { %781 = vlog2.f32 %v1062_v6  ;;  %v339_v18 = vstv %s1042_s29  ;;  %v324_v19 = vmul.f32 %v322_v15, %v322_v15  ;;  %v355_v23 = vstv %s1038_s28  ;;  %s1131_s30 = sld [smem:[#allocation2 + $0xc]] }
  0x49   : > { %783 = vlog2.f32 %v1065_v8  ;;  %vm308_vm6 = vcmp.eq.f32.partialorder %v307_v12, 0.0  ;;  %v340_v22 = vsub.f32 %v1008_v21, %v339_v18  ;;  %v341_v27 = vmul.f32 %v338_v17, %v338_v17  ;;  %s1137_s28 = sld [smem:[#allocation2 + $0x15]] }
  0x4a   : > { %785 = vlog2.f32 %v1071_v10  ;;  %v1085_v26 = vsel %vm308_vm6, 1.0, %v307_v12  ;;  %v356_v28 = vsub.f32 %v1006_v20, %v355_v23  ;;  %v357_v29 = vstv %s1045_s3  ;;  %s1141_s29 = sld [smem:[#allocation2 + $0xd]] }
  0x4b   : > { %787 = vlog2.f32 %v1085_v26  ;;  %v325_v30 = vadd.f32 %v324_v19, %v323_v16  ;;  %v342_v31 = vmul.f32 %v340_v22, %v340_v22  ;;  %v358_v33 = vsub.f32 %v1008_v21, %v357_v29  ;;  %s1146_s3 = sld [smem:[#allocation2 + $0x16]] }
  0x4c   : > { %v359_v34 = vmul.f32 %v356_v28, %v356_v28  ;;  %v204_v35 = vstv %s1054_s5  ;;  %v206_v36 = vstv %s1049_s4  ;;  %v208_v37 = vstv %s1059_s6  ;;  %s1148_s4 = sld [smem:[#allocation2 + $0xe]] }
  0x4d   : > { %vm326_vm7 = vcmp.eq.f32.partialorder %v325_v30, 0.0  ;;  %v343_v38 = vadd.f32 %v342_v31, %v341_v27  ;;  %v360_v39 = vmul.f32 %v358_v33, %v358_v33  ;;  %v205_v40 = vmul.f32 %v1006_v20, %v204_v35  ;;  %s1152_s5 = sld [smem:[#allocation2 + $0x17]] }
  0x4e   : > { %v1101_v41 = vsel %vm326_vm7, 1.0, %v325_v30  ;;  %v209_v42 = vmul.f32 %v1008_v21, %v208_v37  ;;  %v200_v45 = vadd.f32 %v199_v24, %v1025_v32  ;;  %v202_v20 = vmul.f32 %v1008_v21, %v201_v25 }
  0x4f   : > { %789 = vlog2.f32 %v1101_v41  ;;  %vm344_vm8 = vcmp.eq.f32.partialorder %v343_v38, 0.0  ;;  %v361_v43 = vadd.f32 %v360_v39, %v359_v34  ;;  %v207_v44 = vadd.f32 %v206_v36, %v205_v40 }
  0x50   : > { %v1115_v46 = vsel %vm344_vm8, 1.0, %v343_v38  ;;  %v223_v24 = vstv %s1068_s7  ;;  %v241_v32 = vstv %s1074_s8  ;;  %v259_v52 = vstv %s1079_s14 }
  0x51   : > { %791 = vlog2.f32 %v1115_v46  ;;  %vm362_vm9 = vcmp.eq.f32.partialorder %v361_v43, 0.0  ;;  %v210_v48 = vadd.f32 %v209_v42, %v207_v44  ;;  %v226_v53 = vstv %s1091_s17 }
  0x52   : > { %v1124_v51 = vsel %vm362_vm9, 1.0, %v361_v43  ;;  %v203_v55 = vadd.f32 %v202_v20, %v200_v45  ;;  %v244_v58 = vstv %s1093_s21  ;;  %v277_v62 = vstv %s1083_s16  ;;  %s133_s21 = sand.u32 1, %s866_s10  }
  0x53   : > { %v778_v47 = vpop.eup %777  ;;  %793 = vlog2.f32 %v1124_v51  ;;  %v262_v2 = vstv %s1098_s22  ;;  %v280_v16 = vstv %s1105_s23  ;;  %v295_v22 = vstv %s1107_s24  ;;  %s1202_s22 = sshll.u32 %s133_s21, 3  ;;  %s693_s23 = sshll.u32 %s916_s13, 7 }
  0x54   : > { %v780_v49 = vpop.eup %779  ;;  %v221_v50 = vmul.f32 0.6931472, %v778_v47  ;;  %v298_v28 = vstv %s1118_s25  ;;  %v316_v34 = vstv %s1128_s27  ;;  %v331_v42 = vstv %s1131_s30  ;;  %s135_s24 = scalar_lea.vmem [#allocation5], %s1202_s22  ;;  %s1217_s30 = scalar_lea.hbm %s1256_s2, %s693_s23 }
  0x55   : > { %v782_v21 = vpop.eup %781  ;;  %v239_v25 = vmul.f32 0.6931472, %v780_v49  ;;  %v334_v43 = vstv %s1137_s28  ;;  %s575_s25 = sshll.u32 %s135_s24, 4  ;;  %s562_s28 = scalar_lea.sflag [#allocation3], %s133_s21  ;;  %s576_s25 = int_to_ptr.vmem [resolvable:$true] %s575_s25 }
  0x56   : > { %v784_v54 = vpop.eup %783  ;;  %v222_v56 = vmul.f32 %v221_v50, %v1051_v63  ;;  %v257_v57 = vmul.f32 0.6931472, %v782_v21  ;;  %s879_s13 = smov [#allocation5]  }
  0x57   : > { %v786_v59 = vpop.eup %785  ;;  %v240_v60 = vmul.f32 %v239_v25, %v1057_v4  ;;  %v275_v61 = vmul.f32 0.6931472, %v784_v54  ;;  %v352_v25 = vstv %s1146_s3  ;;  %s814_s3 = sshll.u32 %s879_s13, 4  ;;  %s815_s3 = int_to_ptr.vmem [resolvable:$false] %s814_s3 }
  0x58   : > { %v224_v3 = vmul.f32 %v223_v24, %v222_v56  ;;  %v258_v5 = vmul.f32 %v257_v57, %v1062_v6  ;;  %v293_v7 = vmul.f32 0.6931472, %v786_v59  ;;  %v227_v9 = vmul.f32 %v226_v53, %v222_v56  ;;  %v788_v4 = vpop.eup %787  ;;  %p817_p12 = scmp.lt.s32.totalorder %s576_s25, %s815_s3 }
  0x59   : > { %v242_v63 = vmul.f32 %v241_v32, %v240_v60  ;;  %v276_v12 = vmul.f32 %v275_v61, %v1065_v8  ;;  %v245_v15 = vmul.f32 %v244_v58, %v240_v60  ;;  %v311_v23 = vmul.f32 0.6931472, %v788_v4 }
  0x5a   : > { %v225_v17 = vadd.f32 %v224_v3, %v203_v55  ;;  %v260_v18 = vmul.f32 %v259_v52, %v258_v5  ;;  %v294_v19 = vmul.f32 %v293_v7, %v1071_v10  ;;  %v228_v6 = vadd.f32 %v227_v9, %v210_v48 }
  0x5b   : > { %v263_v27 = vmul.f32 %v262_v2, %v258_v5  ;;  %v278_v29 = vmul.f32 %v277_v62, %v276_v12  ;;  %v281_v31 = vmul.f32 %v280_v16, %v276_v12  ;;  %v312_v33 = vmul.f32 %v311_v23, %v1085_v26 }
  0x5c   : > { %v243_v8 = vadd.f32 %v242_v63, %v225_v17  ;;  %v246_v30 = vadd.f32 %v245_v15, %v228_v6  ;;  %v313_v10 = vstv %s1120_s26  ;;  %v790_v35 = vpop.eup %789  ;;  %v296_v37 = vmul.f32 %v295_v22, %v294_v19 }
  0x5d   : > { %v299_v39 = vmul.f32 %v298_v28, %v294_v19  ;;  %v329_v40 = vmul.f32 0.6931472, %v790_v35  ;;  %v314_v20 = vmul.f32 %v313_v10, %v312_v33  ;;  %v317_v48 = vmul.f32 %v316_v34, %v312_v33  ;;  %v775_v33 = vld [vmem:[%s1255_s1 + $0x8] sm:$0xff]   ;;  %v776_v10 = vld [vmem:[%s1255_s1 + $0x10] sm:$0xff]  }
  0x5e   : > { %v261_v36 = vadd.f32 %v260_v18, %v243_v8  ;;  %v264_v38 = vadd.f32 %v263_v27, %v246_v30  ;;  %v792_v44 = vpop.eup %791  ;;  %v349_v32 = vstv %s1141_s29  ;;  %v367_v57 = vstv %s1148_s4  ;;  %s810_s29 = scalar_lea.vmem %s576_s25, 128  ;;  %s816_s4 = scalar_lea.vmem %s815_s3, 256 }
  0x5f   : > { %v330_v26 = vmul.f32 %v329_v40, %v1101_v41  ;;  %v347_v49 = vmul.f32 0.6931472, %v792_v44  ;;  %v370_v59 = vstv %s1152_s5  ;;  %v388_v16 = vshrl.u32 %v137_v0, 7  ;;  %p811_p9 = scmp.ne.s32.totalorder %s576_s25, %s810_s29  ;;  %p818_p13 = scmp.lt.s32.totalorder %s816_s4, %s810_s29 }
  0x60   : > { %v279_v45 = vadd.f32 %v278_v29, %v261_v36  ;;  %v282_v47 = vadd.f32 %v281_v31, %v264_v38  ;;  %v794_v50 = vpop.eup %793  ;;  %v774_v31 = vld [vmem:[%s1255_s1] sm:$0xff]  }
  0x61   : > { %v332_v52 = vmul.f32 %v331_v42, %v330_v26  ;;  %v348_v53 = vmul.f32 %v347_v49, %v1115_v46  ;;  %v365_v54 = vmul.f32 0.6931472, %v794_v50  ;;  %v335_v55 = vmul.f32 %v334_v43, %v330_v26  ;;  %p812_p10 = pnand %p811_p9, %p933_p5  ;;  %p819_p0 = por %p818_p13, %p817_p12 }
  0x62   : > { %v297_v24 = vadd.f32 %v296_v37, %v279_v45  ;;  %v300_v21 = vadd.f32 %v299_v39, %v282_v47  ;;  %v389_v18 = vadd.s32 8, %v388_v16 }
  0x63   : > { %v350_v60 = vmul.f32 %v349_v32, %v348_v53  ;;  %v366_v61 = vmul.f32 %v365_v54, %v1124_v51  ;;  %v353_v62 = vmul.f32 %v352_v25, %v348_v53  ;;  %p813_p11 = pneg %p812_p10 }
  0x64   : > { %v315_v56 = vadd.f32 %v314_v20, %v297_v24  ;;  %v318_v58 = vadd.f32 %v317_v48, %v300_v21 }
  0x65   : > { %v368_v3 = vmul.f32 %v367_v57, %v366_v61  ;;  %v371_v5 = vmul.f32 %v370_v59, %v366_v61  ;;  %p820_p1 = pnand %p819_p0, %p813_p11 }
  0x66   : > { %v333_v41 = vadd.f32 %v332_v52, %v315_v56  ;;  %v336_v2 = vadd.f32 %v335_v55, %v318_v58 }
  0x68   : > { %v351_v7 = vadd.f32 %v350_v60, %v333_v41  ;;  %v354_v9 = vadd.f32 %v353_v62, %v336_v2 }
  0x6a   : > { %v1166_v63 = vadd.f32 %v368_v3, %v351_v7  ;;  %v1168_v12 = vadd.f32 %v371_v5, %v354_v9 }
  0x6c   : > { %v373_v46 = vadd.f32 1.0, %v1166_v63  ;;  %v375_v34 = vadd.f32 1.0, %v1168_v12  ;;  %vm528_vm3 = vcmp.ge.f32.partialorder %v1166_v63, -1.0  ;;  %vm529_vm4 = vcmp.le.f32.partialorder %v1166_v63, 1.0 }
  0x6d   : > { %vm530_vm7 = vmand %vm528_vm3, %vm529_vm4  ;;  %vm531_vm8 = vcmp.ge.f32.partialorder %v1168_v12, -1.0  ;;  %vm550_vm3 = vcmask 1042432   ;;  %vm552_vm4 = vcmask 1043456  }
  0x6e   : > { %v1171_v15 = vmul.f32 7.5, %v373_v46  ;;  %v1188_v35 = vmul.f32 7.5, %v375_v34 }
  0x70   : > { %v379_v4 = vfloor.f32 %v1171_v15  ;;  %v380_v36 = vfloor.f32 %v1188_v35  ;;  %vm537_vm5 = vcmp.ge.f32.partialorder %v1171_v15, 0.0  ;;  %vm538_vm6 = vcmp.le.f32.partialorder %v1171_v15, 15.0 }
  0x71   : > { %vm539_vm9 = vmand %vm537_vm5, %vm538_vm6  ;;  %vm554_vm5 = vcmask 1044480   ;;  %vm556_vm6 = vcmask 1045504  }
  0x72   : > { %v381_v51 = vsub.f32 %v1171_v15, %v379_v4  ;;  %v718_v17 = vtrunc.f32 %v379_v4  ;;  %v720_v37 = vtrunc.f32 %v380_v36  ;;  %v383_v39 = vsub.f32 %v1188_v35, %v380_v36 }
  0x74   : > { %v382_v19 = vsub.f32 1.0, %v381_v51  ;;  %v719_v6 = vcvt.f32.s32 %v718_v17  ;;  %v721_v38 = vcvt.f32.s32 %v720_v37  ;;  %v384_v42 = vsub.f32 1.0, %v383_v39 }
  0x76   : > { %vm390_vm10 = vcmp.eq.s32.totalorder %v388_v16, %v719_v6  ;;  %vm391_vm11 = vcmp.eq.s32.totalorder %v389_v18, %v719_v6  ;;  %v394_v22 = vadd.s32 1, %v719_v6  ;;  %v405_v40 = vadd.s32 1, %v721_v38 }
  0x77   : > { %v392_v23 = vsel %vm390_vm10, %v382_v19, 0.0  ;;  %v393_v27 = vsel %vm391_vm11, %v382_v19, 0.0  ;;  %vm401_vm15 = vcmp.eq.s32.totalorder %v388_v16, %v721_v38  ;;  %vm540_vm10 = vcmp.ge.f32.partialorder %v1188_v35, 0.0  ;;  %vm532_vm11 = vmand %vm530_vm7, %vm531_vm8 }
  0x78   : > { %vm395_vm12 = vcmp.eq.s32.totalorder %v388_v16, %v394_v22  ;;  %vm396_vm13 = vcmp.eq.s32.totalorder %v389_v18, %v394_v22  ;;  %vm406_vm1 = vcmp.eq.s32.totalorder %v388_v16, %v405_v40  ;;  %vm407_vm2 = vcmp.eq.s32.totalorder %v389_v18, %v405_v40 }
  0x79   : > { %v397_v28 = vsel %vm395_vm12, %v381_v51, 0.0  ;;  %v398_v8 = vsel %vm396_vm13, %v381_v51, 0.0  ;;  %v403_v43 = vsel %vm401_vm15, %v384_v42, 0.0  ;;  %v408_v44 = vsel %vm406_vm1, %v383_v39, 0.0  ;;  %vm541_vm13 = vmand %vm539_vm9, %vm540_vm10 }
  0x7a   : > { %v399_v29 = vadd.f32 %v397_v28, %v392_v23  ;;  %v400_v30 = vadd.f32 %v398_v8, %v393_v27  ;;  %v409_v20 = vsel %vm407_vm2, %v383_v39, 0.0  ;;  %v410_v26 = vadd.f32 %v408_v44, %v403_v43 }
  0x7b   : > { %vm533_vm12 = vcmp.le.f32.partialorder %v1168_v12, 1.0  ;;  %vm546_vm15 = vcmask 1040384   ;;  %vm548_vm1 = vcmask 1041408   ;;  %v378_v12 = vsub.f32 %v1188_v35, %v149_v13 }
  0x7c   : > { %v418_v0 = vpack.c.bf16 %v400_v30, %v399_v29  ;;  %v377_v29 = vsub.f32 %v1171_v15, %v994_v14  ;;  %vm558_vm7 = vcmask 1046528  }
  0x7e   : > { %701 = vmatpush3.bf16.msra.mxu0 %v418_v0  ;;  %715 = vmatpush3.bf16.msra.mxu1 %v418_v0 }
  0x81   : > { %703 = vmatmul.mubr.msk.bf16.vlgmr.msra.gmra.mxu0 %vm434_vm14, %v774_v31  ;;  %707 = vmatmul.mubr.msk.bf16.vlgmr.msra.gmra.mxu1 %vm434_vm14, %v775_v33 }
  0x82   : > { %710 = vmatprep.mubr.msk.bf16.mxu1 %vm878_vm0, %v877_v1  ;;  %vm402_vm0 = vcmp.eq.s32.totalorder %v389_v18, %v721_v38 }
  0x83   : > { %v404_v45 = vsel %vm402_vm0, %v384_v42, 0.0  ;;  %vm534_vm0 = vmand %vm532_vm11, %vm533_vm12 }
  0x84   : > { %v411_v49 = vadd.f32 %v409_v20, %v404_v45  ;;  %v690_v33 = vsel %vm534_vm0, 1.0, %v877_v1 }
  0x89   : > { %711 = vmatmul.mubr.msk.bf16.gmra.mxu1 %vm434_vm14, %v776_v10  ;;  %vm542_vm14 = vcmp.le.f32.partialorder %v1188_v35, 15.0 }
  0x8a   : > { %vm543_vm2 = vmand %vm541_vm13, %vm542_vm14 }
  0x8b   : > { %v691_v10 = vsel %vm543_vm2, 1.0, %v877_v1 }
 0x141   : > { %v478_v47 = vpop.f32.mrf.mxu0  ;;  %v486_v48 = vpop.f32.mrf.mxu1 }
 0x142   : > { %v501_v32 = vmul.f32 %v478_v47, %v410_v26  ;;  %v510_v52 = vmul.f32 %v486_v48, %v410_v26 }
 0x143   : > { %v704_v50 = vpop.f32.mrf.mxu0  ;;  %v708_v24 = vpop.f32.mrf.mxu1 }
 0x145   : > { %v481_v21 = vpop.f32.mrf.mxu0  ;;  %v489_v25 = vpop.f32.mrf.mxu1 }
 0x146   : > { %v502_v53 = vmul.f32 %v481_v21, %v411_v49  ;;  %v511_v54 = vmul.f32 %v489_v25, %v411_v49 }
 0x147   : > { %v709_v55 = vpop.f32.mrf.mxu1  ;;  %v705_v56 = vpop.f32.mrf.mxu0 }
 0x148   : > { %v503_v57 = vadd.f32 %v502_v53, %v501_v32  ;;  %v512_v58 = vadd.f32 %v511_v54, %v510_v52 }
 0x149   : > { %v494_v59 = vpop.f32.mrf.mxu1 }
 0x14a   : > { %v504_v60 = vrot.slane %v503_v57, 4  ;;  %v513_v61 = vrot.slane %v512_v58, 4  ;;  %v519_v9 = vmul.f32 %v494_v59, %v410_v26 }
 0x14b   : > { %v712_v62 = vpop.f32.mrf.mxu1 }
 0x14c   : > { %v505_v41 = vadd.f32 %v504_v60, %v503_v57  ;;  %v514_v2 = vadd.f32 %v513_v61, %v512_v58 }
 0x14d   : > { %v497_v3 = vpop.f32.mrf.mxu1 }
 0x14e   : > { %v506_v5 = vrot.slane %v505_v41, 2  ;;  %v515_v7 = vrot.slane %v514_v2, 2  ;;  %v520_v46 = vmul.f32 %v497_v3, %v411_v49 }
 0x14f   : > { %v713_v16 = vpop.f32.mrf.mxu1 }
 0x150   : > { %v521_v4 = vadd.f32 %v520_v46, %v519_v9  ;;  %v507_v51 = vadd.f32 %v506_v5, %v505_v41  ;;  %v516_v17 = vadd.f32 %v515_v7, %v514_v2 }
 0x152   : > { %v522_v18 = vrot.slane %v521_v4, 4  ;;  %v508_v6 = vrot.slane %v507_v51, 1  ;;  %v517_v22 = vrot.slane %v516_v17, 1 }
 0x154   : > { %v523_v19 = vadd.f32 %v522_v18, %v521_v4  ;;  %v509_v63 = vadd.f32 %v508_v6, %v507_v51  ;;  %v518_v28 = vadd.f32 %v517_v22, %v516_v17 }
 0x156   : > { %v524_v23 = vrot.slane %v523_v19, 2  ;;  %v547_v0 = vsel %vm546_vm15, %v509_v63, %v518_v28 }
 0x158   : > { %v525_v27 = vadd.f32 %v524_v23, %v523_v19 }
 0x15a   : > { %v526_v8 = vrot.slane %v525_v27, 1 }
 0x15c   : > { %v527_v30 = vadd.f32 %v526_v8, %v525_v27 }
 0x15e   : > { %v549_v31 = vsel %vm548_vm1, %v547_v0, %v527_v30 }
 0x15f   : > { %v551_v34 = vsel %vm550_vm3, %v549_v31, %v377_v29 }
 0x160   : > { %v553_v11 = vsel %vm552_vm4, %v551_v34, %v378_v12 }
 0x161   : > { %v555_v13 = vsel %vm554_vm5, %v553_v11, %v690_v33 }
 0x162   : > { %v557_v14 = vsel %vm556_vm6, %v555_v13, %v691_v10 }
 0x163   : > { %v559_v15 = vsel %vm558_vm7, %v557_v14, 0.0 }
 0x164   : > { %560 = vst [vmem:[%s135_s24] sm:$0xff] %v559_v15 }
 0x165   : > { %823 = shalt.err (!%p820_p1)
}
 0x166   : > { %s824_s5 = scalar_lea.hbm %s1217_s30, 128  ;;  %s828_s8 = scalar_lea.hbm %s1256_s2, 256 }
 0x167   : > { %p825_p2 = scmp.ne.s32.totalorder %s1217_s30, %s824_s5  ;;  %p829_p7 = scmp.lt.s32.totalorder %s1217_s30, %s1256_s2 }
 0x168   : > { %p830_p8 = scmp.lt.s32.totalorder %s828_s8, %s824_s5 }
 0x169   : > { %p826_p3 = pnand %p825_p2, %p933_p5 }
 0x16a   : > { %p831_p9 = por %p830_p8, %p829_p7 }
 0x16b   : > { %p827_p4 = pneg %p826_p3 }
 0x16d   : > { %p832_p10 = pnand %p831_p9, %p827_p4 }
 0x16f   : > { %835 = shalt.err (!%p832_p10)
}
 0x170   : > { %726 = dma.vmem_to_hbm [thread:$0]  (%p933_p5), %s576_s25, 128, %s1217_s30, %s562_s28  }
 0x171 PF: > { %p738_p11 = scmp.ge.s32.totalorder %s874_s12, 2  ;;  %s587_s17 = sand.u32 1, %s862_s9  }
 0x172   : > { %s588_s21 = scalar_lea.sflag [#allocation3], %s587_s17 }
 0x173   : > { %p733_p12 = pnand %p738_p11, %p937_p6 }
 0x175   : > { %p734_p13 = pneg %p733_p12 }
 0x177   : > { %857 = dma.done.wait (%p734_p13), %s588_s21, 128  }
 0x178   : > { %859 = vsyncadd (%p734_p13), %s588_s21, 4294967168  ;;  %p13_p0 = scmp.ge.s32.totalorder %s920_s15, 4   ;;  %s1260_s9 = smov %s866_s10 }
 0x179   : > { %s1261_s10 = smov %s870_s11  ;;  %s1262_s11 = smov %s931_s18 }
 0x17a   : > { %s1263_s12 = smov %s920_s15  ;;  %15 = sbr.rel (!%p13_p0) target bundleno = 4 (0x4), region = 65 }
 0x17f   :  { %593 = vsyncpa [#allocation3], 1 }
 0x180   :  { %595 = vsyncpa [#allocation3 + $0x1], 1 }
 0x181   :  { %596 = vsyncpa [#allocation4], 1 }
 0x182   :  { %598 = vsyncpa [#allocation4 + $0x1], 1 }

</bundles_post_ra>
